<compile_context>
chip_gen: v7x
topology: tpu7x:2x2x1
jax: 0.10.0
libtpu: 0.0.40
codegen_flags: <defaults>
</compile_context>

<pallas_src>
import numpy as np
import jax
import jax.numpy as jnp
from jax.experimental import pallas as pl
from jax.experimental.pallas import tpu as pltpu

NUM_T = 100          # diffusion timesteps in the schedule
N_FIXED = 16         # the PyTorch forward hard-codes n = 16
_MAX_BLK_F = 8192    # lane-dim tile cap (elements); safe for v5e/v7x VMEM


def _diffusion_kernel(sa_ref, s1_ref, x0_ref, e_ref, x_ref):
    # sa_ref : VMEM (blk_n, 128)   sqrt(a_bar[t])     (lane-broadcast table)
    # s1_ref : VMEM (blk_n, 128)   sqrt(1 - a_bar[t]) (lane-broadcast table)
    # x0_ref : VMEM (blk_n, blk_f) clean input tile
    # e_ref  : VMEM (blk_n, blk_f) Gaussian noise tile
    # x_ref  : VMEM (blk_n, blk_f) noised output tile
    sa = sa_ref[:, :1]                          # (blk_n, 1), broadcasts on lanes
    s1 = s1_ref[:, :1]
    x0 = x0_ref[...].astype(jnp.float32)
    e = e_ref[...].astype(jnp.float32)
    x_ref[...] = (x0 * sa + e * s1).astype(x_ref.dtype)


def _choose_f_blocking(F):
    """Return (F_pad, blk_f): lane-pad F and pick a large lane-dense tile."""
    F128 = -(-F // 128) * 128                   # pad up to a multiple of 128
    if F128 <= _MAX_BLK_F:
        return F128, F128                       # single, full-width block
    n128 = F128 // 128
    # Prefer an exact divisor in (_MAX_BLK_F/2, _MAX_BLK_F]: no extra padding.
    for d in range(_MAX_BLK_F // 128, _MAX_BLK_F // 256, -1):
        if n128 % d == 0:
            return F128, d * 128
    # Otherwise pad F up to a multiple of the max tile (never fall back to
    # tiny 128-wide blocks).
    blk_f = _MAX_BLK_F
    F_pad = -(-F128 // blk_f) * blk_f
    return F_pad, blk_f


def diffusion_forward(x0, key):
    """Pallas implementation of Diffusion.forward.

    Returns (x, e, t, alphas_cumprod); the PyTorch module returns only x, the
    extras are exposed for verification.
    """
    N, C, H, W = x0.shape
    assert N == N_FIXED, "Diffusion.forward hard-codes n = 16 timestep samples"
    F = C * H * W

    # --- schedule + timestep sampling (tiny scalar glue, plain JAX) -------
    betas = jnp.asarray(np.linspace(0.0001, 0.02, NUM_T), dtype=jnp.float32)
    alphas_cumprod = jnp.cumprod(1.0 - betas)                       # (100,)

    k_e, k_t = jax.random.split(key)
    t_half = jax.random.randint(k_t, (N // 2 + 1,), 0, NUM_T, dtype=jnp.int32)
    t = jnp.concatenate([t_half, NUM_T - t_half - 1], axis=0)[:N]   # (16,)

    a = alphas_cumprod[t]                                           # (16,)
    sqrt_a = jnp.sqrt(a).astype(jnp.float32)
    sqrt_1ma = jnp.sqrt(1.0 - a).astype(jnp.float32)
    # Tiny lane-broadcast coefficient tables (8 KiB each).
    sa = jnp.broadcast_to(sqrt_a[:, None], (N, 128))
    s1 = jnp.broadcast_to(sqrt_1ma[:, None], (N, 128))

    # Gaussian noise (torch.randn_like equivalent), generated by XLA RNG.
    e = jax.random.normal(k_e, x0.shape, dtype=x0.dtype)

    # --- tiling ------------------------------------------------------------
    F_pad, blk_f = _choose_f_blocking(F)
    x0_flat = x0.reshape(N, F)
    e_flat = e.reshape(N, F)
    if F_pad != F:
        pad = ((0, 0), (0, F_pad - F))
        x0_flat = jnp.pad(x0_flat, pad)
        e_flat = jnp.pad(e_flat, pad)

    blk_n = N                     # full batch per block; megacore shards the
    grid = (F_pad // blk_f,)      # F-axis grid across TensorCores on v7x

    itemsize = int(np.dtype(x0.dtype).itemsize)
    cost = pl.CostEstimate(
        flops=3 * N * F_pad,
        transcendentals=0,
        bytes_accessed=3 * N * F_pad * itemsize + 2 * N * 128 * 4,
    )

    x_flat = pl.pallas_call(
        _diffusion_kernel,
        out_shape=jax.ShapeDtypeStruct((N, F_pad), x0.dtype),
        grid=grid,
        in_specs=[
            pl.BlockSpec((blk_n, 128), lambda j: (0, 0)),     # sqrt(a_bar[t])
            pl.BlockSpec((blk_n, 128), lambda j: (0, 0)),     # sqrt(1-a_bar[t])
            pl.BlockSpec((blk_n, blk_f), lambda j: (0, j)),   # x0 tile
            pl.BlockSpec((blk_n, blk_f), lambda j: (0, j)),   # e tile
        ],
        out_specs=pl.BlockSpec((blk_n, blk_f), lambda j: (0, j)),  # x tile
        compiler_params=pltpu.CompilerParams(
            dimension_semantics=("parallel",),
            vmem_limit_bytes=32 * 1024 * 1024),
        cost_estimate=cost,
    )(sa, s1, x0_flat, e_flat)

    if F_pad != F:
        x_flat = x_flat[:, :F]
    x = x_flat.reshape(N, C, H, W)
    return x, e, t, alphas_cumprod


if __name__ == "__main__":
    key = jax.random.PRNGKey(0)
    k_x, k_fwd = jax.random.split(key)

    # n = 16 is hard-coded in the PyTorch forward, so x0 must have batch 16.
    x0 = jax.random.normal(k_x, (16, 4, 16, 16), dtype=jnp.float32)

    x, e, t, abar = diffusion_forward(x0, k_fwd)
    x = jax.block_until_ready(x)

    # Reference: x must equal x0*sqrt(a_bar[t]) + e*sqrt(1 - a_bar[t]).
    a = abar[t].reshape(-1, 1, 1, 1)
    x_expected = x0 * jnp.sqrt(a) + e * jnp.sqrt(1.0 - a)
    np.testing.assert_allclose(np.asarray(x), np.asarray(x_expected),
                               rtol=1e-5, atol=1e-5)

    # Sanity check on the noise actually used (65536 samples).
    e_np = np.asarray(e, dtype=np.float64)
    assert abs(e_np.mean()) < 0.05, f"noise mean off: {e_np.mean()}"
    assert abs(e_np.std() - 1.0) < 0.05, f"noise std off: {e_np.std()}"

    print("KERNEL_OK")
</pallas_src>

<mosaic_0001>
module attributes {stable_mosaic.version = 11 : i64} {
  func.func @_diffusion_kernel(%arg0: i32, %arg1: memref<16x128xf32, #tpu.memory_space<vmem>>, %arg2: memref<16x128xf32, #tpu.memory_space<vmem>>, %arg3: memref<16x1024xf32, #tpu.memory_space<vmem>>, %arg4: memref<16x1024xf32, #tpu.memory_space<vmem>>, %arg5: memref<16x1024xf32, #tpu.memory_space<vmem>>) attributes {dimension_semantics = [#tpu.dimension_semantics<parallel>], iteration_bounds = array<i64: 1>, scalar_prefetch = 0 : i64, scratch_operands = 0 : i64, tpu.core_type = #tpu.core_type<tc>, window_params = [{pipeline_mode = #tpu.pipeline_mode<synchronous>, transform_indices = @transform_0, window_bounds = array<i64: 16, 128>}, {pipeline_mode = #tpu.pipeline_mode<synchronous>, transform_indices = @transform_1, window_bounds = array<i64: 16, 128>}, {transform_indices = @transform_2, window_bounds = array<i64: 16, 1024>}, {transform_indices = @transform_3, window_bounds = array<i64: 16, 1024>}, {transform_indices = @transform_4, window_bounds = array<i64: 16, 1024>}]} {
    %c0 = arith.constant 0 : index
    %c0_0 = arith.constant 0 : index
    %0 = vector.load %arg1[%c0, %c0_0] : memref<16x128xf32, #tpu.memory_space<vmem>>, vector<16x1xf32>
    %c0_1 = arith.constant 0 : index
    %c0_2 = arith.constant 0 : index
    %1 = vector.load %arg2[%c0_1, %c0_2] : memref<16x128xf32, #tpu.memory_space<vmem>>, vector<16x1xf32>
    %c0_3 = arith.constant 0 : index
    %c0_4 = arith.constant 0 : index
    %2 = vector.load %arg3[%c0_3, %c0_4] : memref<16x1024xf32, #tpu.memory_space<vmem>>, vector<16x1024xf32>
    %c0_5 = arith.constant 0 : index
    %c0_6 = arith.constant 0 : index
    %3 = vector.load %arg4[%c0_5, %c0_6] : memref<16x1024xf32, #tpu.memory_space<vmem>>, vector<16x1024xf32>
    %4 = vector.broadcast %0 : vector<16x1xf32> to vector<16x1024xf32>
    %5 = arith.mulf %2, %4 : vector<16x1024xf32>
    %6 = vector.broadcast %1 : vector<16x1xf32> to vector<16x1024xf32>
    %7 = arith.mulf %3, %6 : vector<16x1024xf32>
    %8 = arith.addf %5, %7 : vector<16x1024xf32>
    %c0_7 = arith.constant 0 : index
    %c0_8 = arith.constant 0 : index
    %9 = vector.load %arg5[%c0_7, %c0_8] : memref<16x1024xf32, #tpu.memory_space<vmem>>, vector<16x1024xf32>
    tpu.vector_store %arg5[%c0_7, %c0_8], %8 {strides = array<i32>} : memref<16x1024xf32, #tpu.memory_space<vmem>>, vector<16x1024xf32>,
    return
  }
  func.func @transform_0(%arg0: i32) -> (i32, i32) {
    %c0_i32 = arith.constant 0 : i32
    %c0_i32_0 = arith.constant 0 : i32
    %c0_i32_1 = arith.constant 0 : i32
    return %c0_i32, %c0_i32_0 : i32, i32
  }
  func.func @transform_1(%arg0: i32) -> (i32, i32) {
    %c0_i32 = arith.constant 0 : i32
    %c0_i32_0 = arith.constant 0 : i32
    %c0_i32_1 = arith.constant 0 : i32
    return %c0_i32, %c0_i32_0 : i32, i32
  }
  func.func @transform_2(%arg0: i32) -> (i32, i32) {
    %c0_i32 = arith.constant 0 : i32
    %c0_i32_0 = arith.constant 0 : i32
    return %c0_i32, %arg0 : i32, i32
  }
  func.func @transform_3(%arg0: i32) -> (i32, i32) {
    %c0_i32 = arith.constant 0 : i32
    %c0_i32_0 = arith.constant 0 : i32
    return %c0_i32, %arg0 : i32, i32
  }
  func.func @transform_4(%arg0: i32) -> (i32, i32) {
    %c0_i32 = arith.constant 0 : i32
    %c0_i32_0 = arith.constant 0 : i32
    return %c0_i32, %arg0 : i32, i32
  }
}

</mosaic_0001>

<bundles_post_ra>
// kernel: tpu_custom_call.1
= control target key start
LH: loop header
LB: loop body
LE: loop exit
PB: predicated region body
PF: predicated region fallthrough
CT: control target
= control target key end

     0   :  { %9 = vsyncpa [#allocation3], 0  ;;  %s453_s0 = inlined_call_operand.hbm [shape: f32[16,128], index: 0, kind: input, shape index: {}]   ;;  %s454_s1 = inlined_call_operand.hbm [shape: f32[16,128], index: 1, kind: input, shape index: {}]   ;;  %s455_s2 = inlined_call_operand.hbm [shape: f32[16,1024], index: 2, kind: input, shape index: {}]   ;;  %s456_s3 = inlined_call_operand.hbm [shape: f32[16,1024], index: 3, kind: input, shape index: {}]   ;;  %s457_s4 = inlined_call_operand.hbm [shape: f32[16,1024], index: 4, kind: output, shape index: {}]  }
   0x1   :  { %10 = vsyncpa [#allocation6], 0 }
   0x2   :  { %11 = vsyncpa [#allocation9], 0 }
   0x3   :  { %12 = vsyncpa [#allocation4], 0  ;;  %s342_s15 = smov [#allocation5]   ;;  %s343_s17 = smov [#allocation2]  }
   0x4   :  { %s30_s16 = sshll.u32 %s342_s15, 4  ;;  %s18_s18 = sshll.u32 %s343_s17, 4  ;;  %s31_s16 = int_to_ptr.vmem [resolvable:$true] %s30_s16  ;;  %s377_s18 = int_to_ptr.vmem [resolvable:$true] %s18_s18 }
   0x5   :  { %s224_s21 = scalar_lea.hbm %s454_s1, 256 }
   0x6   :  { %p225_p0 = scmp.ne.s32.totalorder %s454_s1, %s224_s21  ;;  %p228_p1 = scmp.lt.u32.totalorder %s224_s21, %s454_s1 }
   0x8   :  { %p230_p2 = pnand %p228_p1, %p225_p0 }
   0xa   :  { %233 = shalt.err (!%p230_p2)
}
   0xb   :  { %s234_s26 = scalar_lea.vmem %s31_s16, 256  ;;  %p239_p4 = scmp.lt.s32.totalorder %s31_s16, %s31_s16 }
   0xc   :  { %p235_p3 = scmp.ne.s32.totalorder %s31_s16, %s234_s26  ;;  %p240_p5 = scmp.lt.s32.totalorder %s234_s26, %s234_s26 }
   0xe   :  { %p241_p6 = por %p240_p5, %p239_p4 }
  0x10   :  { %p242_p7 = pnand %p241_p6, %p235_p3 }
  0x12   :  { %245 = shalt.err (!%p242_p7)
}
  0x13   :  { %s344_s27 = smov 128   ;;  %s345_s28 = smov 8  }
  0x14   :  { %36 = dma.hbm_to_vmem [thread:$0]  %s454_s1, 256, %s31_s16, [#allocation6], %s344_s27, %s344_s27, %s345_s28  }
  0x15   :  { %s246_s7 = scalar_lea.hbm %s453_s0, 256 }
  0x16   :  { %p247_p8 = scmp.ne.s32.totalorder %s453_s0, %s246_s7  ;;  %p250_p9 = scmp.lt.u32.totalorder %s246_s7, %s453_s0 }
  0x18   :  { %p252_p10 = pnand %p250_p9, %p247_p8 }
  0x1a   :  { %255 = shalt.err (!%p252_p10)
}
  0x1b   :  { %s256_s12 = scalar_lea.vmem %s377_s18, 256  ;;  %p261_p12 = scmp.lt.s32.totalorder %s377_s18, %s377_s18 }
  0x1c   :  { %p257_p11 = scmp.ne.s32.totalorder %s377_s18, %s256_s12  ;;  %p262_p13 = scmp.lt.s32.totalorder %s256_s12, %s256_s12 }
  0x1e   :  { %p263_p0 = por %p262_p13, %p261_p12 }
  0x20   :  { %p264_p1 = pnand %p263_p0, %p257_p11 }
  0x22   :  { %267 = shalt.err (!%p264_p1)
}
  0x23   :  { %24 = dma.hbm_to_vmem [thread:$0]  %s453_s0, 256, %s377_s18, [#allocation3], %s344_s27, %s344_s27, %s345_s28  }
  0x24   :  { %s346_s14 = smov [#allocation7]   ;;  %s268_s19 = scalar_lea.hbm %s455_s2, 2048 }
  0x25   :  { %s42_s15 = sshll.u32 %s346_s14, 4  ;;  %p269_p2 = scmp.ne.s32.totalorder %s455_s2, %s268_s19  ;;  %s43_s15 = int_to_ptr.vmem [resolvable:$true] %s42_s15 }
  0x26   :  { %p272_p3 = scmp.lt.u32.totalorder %s268_s19, %s455_s2 }
  0x28   :  { %p274_p4 = pnand %p272_p3, %p269_p2 }
  0x2a   :  { %277 = shalt.err (!%p274_p4)
}
  0x2b   :  { %s278_s24 = scalar_lea.vmem %s43_s15, 2048  ;;  %p283_p6 = scmp.lt.s32.totalorder %s43_s15, %s43_s15 }
  0x2c   :  { %p279_p5 = scmp.ne.s32.totalorder %s43_s15, %s278_s24  ;;  %p284_p7 = scmp.lt.s32.totalorder %s278_s24, %s278_s24 }
  0x2e   :  { %p285_p8 = por %p284_p7, %p283_p6 }
  0x30   :  { %p286_p9 = pnand %p285_p8, %p279_p5 }
  0x32   :  { %289 = shalt.err (!%p286_p9)
}
  0x33   :  { %s347_s0 = smov 1024   ;;  %s348_s18 = smov 64  }
  0x34   :  { %48 = dma.hbm_to_vmem [thread:$0]  %s455_s2, 2048, %s43_s15, [#allocation6], %s347_s0, %s347_s0, %s348_s18  }
  0x35   :  { %s349_s27 = smov [#allocation8]   ;;  %s290_s5 = scalar_lea.hbm %s456_s3, 2048 }
  0x36   :  { %s54_s28 = sshll.u32 %s349_s27, 4  ;;  %p291_p10 = scmp.ne.s32.totalorder %s456_s3, %s290_s5  ;;  %s55_s28 = int_to_ptr.vmem [resolvable:$true] %s54_s28 }
  0x37   :  { %p294_p11 = scmp.lt.u32.totalorder %s290_s5, %s456_s3 }
  0x39   :  { %p296_p12 = pnand %p294_p11, %p291_p10 }
  0x3b   :  { %299 = shalt.err (!%p296_p12)
}
  0x3c   :  { %s300_s10 = scalar_lea.vmem %s55_s28, 2048  ;;  %p305_p0 = scmp.lt.s32.totalorder %s55_s28, %s55_s28 }
  0x3d   :  { %p301_p13 = scmp.ne.s32.totalorder %s55_s28, %s300_s10  ;;  %p306_p1 = scmp.lt.s32.totalorder %s300_s10, %s300_s10 }
  0x3f   :  { %p307_p2 = por %p306_p1, %p305_p0 }
  0x41   :  { %p308_p3 = pnand %p307_p2, %p301_p13 }
  0x43   :  { %311 = shalt.err (!%p308_p3)
}
  0x44   :  { %60 = dma.hbm_to_vmem [thread:$0]  %s456_s3, 2048, %s55_s28, [#allocation9], %s347_s0, %s347_s0, %s348_s18  }
  0x45   :  { %334 = dma.done.wait [#allocation3], 256  }
  0x46   :  { %335 = vsyncadd [#allocation3], 4294967040 }
  0x47   :  { %336 = dma.done.wait [#allocation6], 2304  }
  0x48   :  { %337 = vsyncadd [#allocation6], 4294964992 }
  0x49   :  { %338 = dma.done.wait [#allocation9], 2048  }
  0x4a   :  { %339 = vsyncadd [#allocation9], 4294965248  ;;  %v350_v0 = vmov 0   ;;  %v75_v1 = vld [vmem:[#allocation5] sm:$0xff]  ;;  %v73_v2 = vld [vmem:[#allocation2] sm:$0xff]  ;;  %s351_s3 = smov [#allocation10]  }
  0x4b   :  { %223 = vset.pattern.permute.xlu1 %v350_v0  ;;  %222 = vset.pattern.permute.xlu0 %v350_v0  ;;  %v76_v3 = vld [vmem:[#allocation5 + $0x8] sm:$0xff]  ;;  %v74_v4 = vld [vmem:[#allocation2 + $0x8] sm:$0xff]  ;;  %v93_v5 = vld [vmem:[#allocation8] sm:$0xff]  ;;  %s198_s12 = sshll.u32 %s351_s3, 4  ;;  %s199_s12 = int_to_ptr.vmem [resolvable:$true] %s198_s12 }
  0x4c   :  { %137 = vperm.xlu1 %223, %v75_v1   ;;  %111 = vperm.xlu0 %222, %v73_v2   ;;  %v94_v6 = vld [vmem:[#allocation8 + $0x8] sm:$0xff]  ;;  %v95_v7 = vld [vmem:[#allocation8 + $0x10] sm:$0xff]  ;;  %v96_v8 = vld [vmem:[#allocation8 + $0x18] sm:$0xff]  ;;  %s312_s1 = scalar_lea.vmem %s199_s12, 2048  ;;  %p317_p5 = scmp.lt.s32.totalorder %s199_s12, %s199_s12 }
  0x4d   :  { %v97_v9 = vld [vmem:[#allocation8 + $0x20] sm:$0xff]  ;;  %v98_v10 = vld [vmem:[#allocation8 + $0x28] sm:$0xff]  ;;  %v99_v11 = vld [vmem:[#allocation8 + $0x30] sm:$0xff]  ;;  %p313_p4 = scmp.ne.s32.totalorder %s199_s12, %s312_s1  ;;  %p318_p6 = scmp.lt.s32.totalorder %s312_s1, %s312_s1 }
  0x4e   :  { %v100_v12 = vld [vmem:[#allocation8 + $0x38] sm:$0xff]  ;;  %v77_v13 = vld [vmem:[#allocation7] sm:$0xff]  ;;  %v78_v14 = vld [vmem:[#allocation7 + $0x8] sm:$0xff] }
  0x4f   :  { %v79_v16 = vld [vmem:[#allocation7 + $0x10] sm:$0xff]  ;;  %v80_v17 = vld [vmem:[#allocation7 + $0x18] sm:$0xff]  ;;  %v81_v18 = vld [vmem:[#allocation7 + $0x20] sm:$0xff]  ;;  %p319_p7 = por %p318_p6, %p317_p5 }
  0x50   :  { %142 = vperm.xlu1 %223, %v76_v3   ;;  %116 = vperm.xlu0 %222, %v74_v4   ;;  %v82_v24 = vld [vmem:[#allocation7 + $0x28] sm:$0xff]  ;;  %v83_v25 = vld [vmem:[#allocation7 + $0x30] sm:$0xff]  ;;  %v84_v26 = vld [vmem:[#allocation7 + $0x38] sm:$0xff] }
  0x51   :  { %v101_v31 = vld [vmem:[#allocation8 + $0x40] sm:$0xff]  ;;  %v102_v36 = vld [vmem:[#allocation8 + $0x48] sm:$0xff]  ;;  %v103_v37 = vld [vmem:[#allocation8 + $0x50] sm:$0xff]  ;;  %p320_p8 = pnand %p319_p7, %p313_p4 }
  0x52   :  { %v104_v38 = vld [vmem:[#allocation8 + $0x58] sm:$0xff]  ;;  %v105_v43 = vld [vmem:[#allocation8 + $0x60] sm:$0xff]  ;;  %v106_v44 = vld [vmem:[#allocation8 + $0x68] sm:$0xff] }
  0x53   :  { %v107_v45 = vld [vmem:[#allocation8 + $0x70] sm:$0xff]  ;;  %v108_v51 = vld [vmem:[#allocation8 + $0x78] sm:$0xff]  ;;  %v85_v52 = vld [vmem:[#allocation7 + $0x40] sm:$0xff] }
  0x54   :  { %v86_v53 = vld [vmem:[#allocation7 + $0x48] sm:$0xff]  ;;  %v87_v58 = vld [vmem:[#allocation7 + $0x50] sm:$0xff]  ;;  %v88_v59 = vld [vmem:[#allocation7 + $0x58] sm:$0xff] }
  0x55   :  { %v89_v60 = vld [vmem:[#allocation7 + $0x60] sm:$0xff]  ;;  %v90_v2 = vld [vmem:[#allocation7 + $0x68] sm:$0xff]  ;;  %v91_v3 = vld [vmem:[#allocation7 + $0x70] sm:$0xff] }
  0x56   :  { %v92_v4 = vld [vmem:[#allocation7 + $0x78] sm:$0xff] }
  0xcb   :  { %v138_v15 = vpop.permute.xlu1 %137  ;;  %v112_v19 = vpop.permute.xlu0 %111 }
  0xcc   :  { %v145_v20 = vmul.f32 %v138_v15, %v93_v5  ;;  %v146_v21 = vmul.f32 %v138_v15, %v94_v6  ;;  %v147_v22 = vmul.f32 %v138_v15, %v95_v7  ;;  %v148_v23 = vmul.f32 %v138_v15, %v96_v8 }
  0xcd   :  { %v149_v27 = vmul.f32 %v138_v15, %v97_v9  ;;  %v150_v28 = vmul.f32 %v138_v15, %v98_v10  ;;  %v151_v29 = vmul.f32 %v138_v15, %v99_v11  ;;  %v152_v30 = vmul.f32 %v138_v15, %v100_v12 }
  0xce   :  { %v119_v32 = vmul.f32 %v112_v19, %v77_v13  ;;  %v120_v33 = vmul.f32 %v112_v19, %v78_v14  ;;  %v121_v34 = vmul.f32 %v112_v19, %v79_v16  ;;  %v122_v35 = vmul.f32 %v112_v19, %v80_v17 }
  0xcf   :  { %v123_v39 = vmul.f32 %v112_v19, %v81_v18  ;;  %v124_v40 = vmul.f32 %v112_v19, %v82_v24  ;;  %v125_v41 = vmul.f32 %v112_v19, %v83_v25  ;;  %v126_v42 = vmul.f32 %v112_v19, %v84_v26  ;;  %v143_v46 = vpop.permute.xlu1 %142  ;;  %v117_v61 = vpop.permute.xlu0 %116 }
  0xd0   :  { %v161_v47 = vadd.f32 %v145_v20, %v119_v32  ;;  %v162_v48 = vadd.f32 %v146_v21, %v120_v33  ;;  %v163_v49 = vadd.f32 %v147_v22, %v121_v34  ;;  %v164_v50 = vadd.f32 %v148_v23, %v122_v35 }
  0xd1   :  { %v165_v54 = vadd.f32 %v149_v27, %v123_v39  ;;  %v166_v55 = vadd.f32 %v150_v28, %v124_v40  ;;  %v167_v56 = vadd.f32 %v151_v29, %v125_v41  ;;  %v168_v57 = vadd.f32 %v152_v30, %v126_v42 }
  0xd2   :  { %177 = vst [vmem:[#allocation10] sm:$0xff] %v161_v47  ;;  %178 = vst [vmem:[#allocation10 + $0x8] sm:$0xff] %v162_v48  ;;  %v153_v62 = vmul.f32 %v143_v46, %v101_v31  ;;  %v154_v63 = vmul.f32 %v143_v46, %v102_v36  ;;  %v155_v0 = vmul.f32 %v143_v46, %v103_v37 }
  0xd3   :  { %179 = vst [vmem:[#allocation10 + $0x10] sm:$0xff] %v163_v49  ;;  %180 = vst [vmem:[#allocation10 + $0x18] sm:$0xff] %v164_v50  ;;  %v156_v1 = vmul.f32 %v143_v46, %v104_v38  ;;  %v157_v5 = vmul.f32 %v143_v46, %v105_v43  ;;  %v158_v6 = vmul.f32 %v143_v46, %v106_v44 }
  0xd4   :  { %181 = vst [vmem:[#allocation10 + $0x20] sm:$0xff] %v165_v54  ;;  %182 = vst [vmem:[#allocation10 + $0x28] sm:$0xff] %v166_v55  ;;  %v159_v7 = vmul.f32 %v143_v46, %v107_v45  ;;  %v160_v8 = vmul.f32 %v143_v46, %v108_v51  ;;  %v127_v9 = vmul.f32 %v117_v61, %v85_v52 }
  0xd5   :  { %183 = vst [vmem:[#allocation10 + $0x30] sm:$0xff] %v167_v56  ;;  %184 = vst [vmem:[#allocation10 + $0x38] sm:$0xff] %v168_v57  ;;  %v128_v10 = vmul.f32 %v117_v61, %v86_v53  ;;  %v129_v11 = vmul.f32 %v117_v61, %v87_v58  ;;  %v130_v12 = vmul.f32 %v117_v61, %v88_v59 }
  0xd6   :  { %v131_v13 = vmul.f32 %v117_v61, %v89_v60  ;;  %v132_v14 = vmul.f32 %v117_v61, %v90_v2  ;;  %v133_v15 = vmul.f32 %v117_v61, %v91_v3  ;;  %v134_v16 = vmul.f32 %v117_v61, %v92_v4 }
  0xd7   :  { %v169_v17 = vadd.f32 %v153_v62, %v127_v9  ;;  %v170_v18 = vadd.f32 %v154_v63, %v128_v10  ;;  %v171_v19 = vadd.f32 %v155_v0, %v129_v11  ;;  %v172_v20 = vadd.f32 %v156_v1, %v130_v12 }
  0xd8   :  { %v173_v21 = vadd.f32 %v157_v5, %v131_v13  ;;  %v174_v22 = vadd.f32 %v158_v6, %v132_v14  ;;  %v175_v23 = vadd.f32 %v159_v7, %v133_v15  ;;  %v176_v24 = vadd.f32 %v160_v8, %v134_v16 }
  0xd9   :  { %185 = vst [vmem:[#allocation10 + $0x40] sm:$0xff] %v169_v17  ;;  %186 = vst [vmem:[#allocation10 + $0x48] sm:$0xff] %v170_v18 }
  0xda   :  { %187 = vst [vmem:[#allocation10 + $0x50] sm:$0xff] %v171_v19  ;;  %188 = vst [vmem:[#allocation10 + $0x58] sm:$0xff] %v172_v20 }
  0xdb   :  { %189 = vst [vmem:[#allocation10 + $0x60] sm:$0xff] %v173_v21  ;;  %190 = vst [vmem:[#allocation10 + $0x68] sm:$0xff] %v174_v22 }
  0xdc   :  { %191 = vst [vmem:[#allocation10 + $0x70] sm:$0xff] %v175_v23  ;;  %192 = vst [vmem:[#allocation10 + $0x78] sm:$0xff] %v176_v24 }
  0xdd   :  { %323 = shalt.err (!%p320_p8)
}
  0xde   :  { %s324_s15 = scalar_lea.hbm %s457_s4, 2048 }
  0xdf   :  { %p325_p9 = scmp.ne.s32.totalorder %s457_s4, %s324_s15  ;;  %p328_p10 = scmp.lt.u32.totalorder %s324_s15, %s457_s4 }
  0xe1   :  { %p330_p11 = pnand %p328_p10, %p325_p9 }
  0xe3   :  { %333 = shalt.err (!%p330_p11)
}
  0xe4   :  { %204 = dma.vmem_to_hbm [thread:$0]  %s199_s12, 2048, %s457_s4, [#allocation4], %s347_s0, %s347_s0, %s348_s18  }
  0xe5   :  { %340 = dma.done.wait [#allocation4], 2048  }
  0xe6   :  { %341 = vsyncadd [#allocation4], 4294965248 }
  0xe7   :  { %208 = vsyncpa [#allocation3], 1 }
  0xe8   :  { %209 = vsyncpa [#allocation6], 1 }
  0xe9   :  { %210 = vsyncpa [#allocation9], 1 }
  0xea   :  { %211 = vsyncpa [#allocation4], 1 }

</bundles_post_ra>
